<compile_context>
chip_gen: v5e
topology: v5e:2x2
jax: 0.10.0
libtpu: 0.0.40
codegen_flags: <defaults>
</compile_context>

<pallas_src>
import functools
import math

import jax
import jax.numpy as jnp
from jax.experimental import pallas as pl
from jax.experimental.pallas import tpu as pltpu


# ---------------------------------------------------------------------------
# Kernel 1: lane-dense linear projection  y = x @ w + b
# ---------------------------------------------------------------------------
def _linear_kernel(x_ref, w_ref, b_ref, y_ref):
    # x: (1, TR, d_in) bf16, w: (d_in, d_out) bf16, b: (1, d_out) f32
    y = jnp.dot(x_ref[0], w_ref[...], preferred_element_type=jnp.float32)
    y_ref[0] = (y + b_ref[...]).astype(y_ref.dtype)


def _linear(x, w, b, *, row_tile):
    """x: (B, N, d_in) bf16, w: (d_in, d_out) bf16, b: (1, d_out) f32 -> bf16."""
    B, N, d_in = x.shape
    d_out = w.shape[1]
    assert N % row_tile == 0
    return pl.pallas_call(
        _linear_kernel,
        out_shape=jax.ShapeDtypeStruct((B, N, d_out), jnp.bfloat16),
        grid_spec=pltpu.PrefetchScalarGridSpec(
            num_scalar_prefetch=0,
            grid=(B, N // row_tile),
            in_specs=[
                pl.BlockSpec((1, row_tile, d_in), lambda bi, ri: (bi, ri, 0)),
                pl.BlockSpec((d_in, d_out), lambda bi, ri: (0, 0)),
                pl.BlockSpec((1, d_out), lambda bi, ri: (0, 0)),
            ],
            out_specs=pl.BlockSpec((1, row_tile, d_out),
                                   lambda bi, ri: (bi, ri, 0)),
        ),
        compiler_params=pltpu.CompilerParams(
            dimension_semantics=("parallel", "parallel"),
            vmem_limit_bytes=64 * 1024 * 1024),
    )(x, w, b)


# ---------------------------------------------------------------------------
# Kernel 2: attention over all heads for one (batch, q-tile) step
# ---------------------------------------------------------------------------
def _mha_kernel(q_ref, k_ref, v_ref, wo_ref, bo_ref, out_ref, *, h):
    """q: (1,h,TQ,d_k)  k: (1,h,nk,d_k)  v: (1,h,nk,d_v)  (all bf16)
       wo: (h,d_v,d_model) bf16   bo: (1,d_model) f32   out: (1,TQ,d_model)"""
    q = q_ref[0]                                   # (h, TQ, d_k)
    k = k_ref[0]                                   # (h, nk, d_k)
    v = v_ref[0]                                   # (h, nk, d_v)

    # Scores: 1/sqrt(d_k) already folded into the Q projection at trace time.
    s = jnp.einsum("hqd,hkd->hqk", q, k,
                   preferred_element_type=jnp.float32)        # (h, TQ, nk)

    # Numerically stable softmax numerator; normalize AFTER the PV matmul.
    s = s - jnp.max(s, axis=-1, keepdims=True)
    p = jnp.exp(s)                                             # (h, TQ, nk) f32
    denom = jnp.sum(p, axis=-1, keepdims=True)                 # (h, TQ, 1)  f32

    o = jnp.einsum("hqk,hkd->hqd", p.astype(jnp.bfloat16), v,
                   preferred_element_type=jnp.float32)         # (h, TQ, d_v)
    o = o * pl.reciprocal(denom, approx=True)                  # post-PV normalize

    # Output projection: accumulate heads straight into the d_model output.
    tq = q.shape[1]
    d_model = wo_ref.shape[2]
    acc = jnp.zeros((tq, d_model), jnp.float32)
    for hh in range(h):                                        # h is static
        acc = acc + jnp.dot(o[hh].astype(jnp.bfloat16), wo_ref[hh],
                            preferred_element_type=jnp.float32)
    out_ref[0] = (acc + bo_ref[...]).astype(out_ref.dtype)


# ---------------------------------------------------------------------------
# Wrapper
# ---------------------------------------------------------------------------
def _round_up(x, m):
    return ((x + m - 1) // m) * m


def _pad_rows(x, n_to):
    b, n, d = x.shape
    if n_to == n:
        return x
    return jnp.pad(x, ((0, 0), (0, n_to - n), (0, 0)))


def scaled_dot_product_attention(queries, keys, values, params, *, h, d_k, d_v,
                                 q_tile=256):
    """queries: (b_s, nq, d_model), keys/values: (b_s, nk, d_model)."""
    b_s, nq, d_model = queries.shape
    nk = keys.shape[1]
    wq, bq, wk, bk, wv, bv, wo, bo = params

    # --- trace-time weight prep: fold softmax scale into Q proj, pre-cast bf16.
    scale = 1.0 / math.sqrt(d_k)
    wq_s = (wq * scale).astype(jnp.bfloat16)                 # (d_model, h*d_k)
    bq_s = (bq * scale).reshape(1, h * d_k).astype(jnp.float32)
    wk_b = wk.astype(jnp.bfloat16)
    bk_2 = bk.reshape(1, h * d_k).astype(jnp.float32)
    wv_b = wv.astype(jnp.bfloat16)
    bv_2 = bv.reshape(1, h * d_v).astype(jnp.float32)
    wo_hm = wo.reshape(h, d_v, d_model).astype(jnp.bfloat16) # (h, d_v, d_model)
    bo_2 = bo.reshape(1, d_model).astype(jnp.float32)

    # --- trace-time activation pre-cast (halves HBM->VMEM DMA bytes).
    q_bf = queries.astype(jnp.bfloat16)
    k_bf = keys.astype(jnp.bfloat16)
    v_bf = values.astype(jnp.bfloat16)

    # --- tiling / padding (no full-nq fallback; padded rows sliced off below).
    tq = min(q_tile, _round_up(nq, 128))
    nq_p = _round_up(nq, tq)
    kv_tile = min(256, _round_up(nk, 128))
    nk_p = _round_up(nk, kv_tile)

    # --- lane-dense projections: done ONCE, not per q tile / per head.
    q_proj = _linear(_pad_rows(q_bf, nq_p), wq_s, bq_s, row_tile=tq)
    k_proj = _linear(_pad_rows(k_bf, nk_p), wk_b, bk_2, row_tile=kv_tile)[:, :nk]
    v_proj = _linear(_pad_rows(v_bf, nk_p), wv_b, bv_2, row_tile=kv_tile)[:, :nk]

    # --- head-major layout for the attention kernel (trace-time XLA reshape).
    q_hm = q_proj.reshape(b_s, nq_p, h, d_k).transpose(0, 2, 1, 3)  # (b,h,nq_p,d_k)
    k_hm = k_proj.reshape(b_s, nk, h, d_k).transpose(0, 2, 1, 3)    # (b,h,nk,d_k)
    v_hm = v_proj.reshape(b_s, nk, h, d_v).transpose(0, 2, 1, 3)    # (b,h,nk,d_v)

    n_q_tiles = nq_p // tq
    kernel = functools.partial(_mha_kernel, h=h)

    out = pl.pallas_call(
        kernel,
        out_shape=jax.ShapeDtypeStruct((b_s, nq_p, d_model), queries.dtype),
        grid_spec=pltpu.PrefetchScalarGridSpec(
            num_scalar_prefetch=0,
            grid=(b_s, n_q_tiles),
            in_specs=[
                pl.BlockSpec((1, h, tq, d_k), lambda b, qi: (b, 0, qi, 0)),  # q
                pl.BlockSpec((1, h, nk, d_k), lambda b, qi: (b, 0, 0, 0)),   # k
                pl.BlockSpec((1, h, nk, d_v), lambda b, qi: (b, 0, 0, 0)),   # v
                pl.BlockSpec((h, d_v, d_model), lambda b, qi: (0, 0, 0)),    # wo
                pl.BlockSpec((1, d_model), lambda b, qi: (0, 0)),            # bo
            ],
            out_specs=pl.BlockSpec((1, tq, d_model), lambda b, qi: (b, qi, 0)),
        ),
        compiler_params=pltpu.CompilerParams(
            dimension_semantics=("parallel", "parallel"),
            vmem_limit_bytes=64 * 1024 * 1024),
    )(q_hm, k_hm, v_hm, wo_hm, bo_2)

    return out[:, :nq]


# ---------------------------------------------------------------------------
# Parameter init matching the PyTorch module (Linear: std=0.001 weights, 0 bias)
# ---------------------------------------------------------------------------
def init_params(key, d_model, d_k, d_v, h):
    """Weights stored pre-transposed as (in_features, out_features)."""
    k1, k2, k3, k4 = jax.random.split(key, 4)
    std = 0.001
    wq = jax.random.normal(k1, (d_model, h * d_k), jnp.float32) * std
    wk = jax.random.normal(k2, (d_model, h * d_k), jnp.float32) * std
    wv = jax.random.normal(k3, (d_model, h * d_v), jnp.float32) * std
    wo = jax.random.normal(k4, (h * d_v, d_model), jnp.float32) * std
    bq = jnp.zeros((h * d_k,), jnp.float32)
    bk = jnp.zeros((h * d_k,), jnp.float32)
    bv = jnp.zeros((h * d_v,), jnp.float32)
    bo = jnp.zeros((d_model,), jnp.float32)
    return (wq, bq, wk, bk, wv, bv, wo, bo)


def reference_attention(queries, keys, values, params, *, h, d_k, d_v):
    """Pure-JAX (f32) reference mirroring the PyTorch forward (eval mode)."""
    wq, bq, wk, bk, wv, bv, wo, bo = params
    b_s, nq, d_model = queries.shape
    nk = keys.shape[1]
    q = (queries @ wq + bq).reshape(b_s, nq, h, d_k).transpose(0, 2, 1, 3)
    k = (keys @ wk + bk).reshape(b_s, nk, h, d_k).transpose(0, 2, 3, 1)
    v = (values @ wv + bv).reshape(b_s, nk, h, d_v).transpose(0, 2, 1, 3)
    att = jnp.einsum("bhqd,bhdk->bhqk", q, k) / math.sqrt(d_k)
    att = jax.nn.softmax(att, axis=-1)
    out = jnp.einsum("bhqk,bhkd->bhqd", att, v).transpose(0, 2, 1, 3)
    out = out.reshape(b_s, nq, h * d_v)
    return out @ wo + bo


if __name__ == "__main__":
    # Lane-dense small shapes: d_model and seq are multiples of 128.
    b_s, nq, nk = 2, 128, 128
    d_model, d_k, d_v, h = 128, 32, 32, 4

    key = jax.random.PRNGKey(0)
    kq, kk, kv, kp = jax.random.split(key, 4)
    queries = jax.random.normal(kq, (b_s, nq, d_model), jnp.float32)
    keys = jax.random.normal(kk, (b_s, nk, d_model), jnp.float32)
    values = jax.random.normal(kv, (b_s, nk, d_model), jnp.float32)
    params = init_params(kp, d_model, d_k, d_v, h)

    out = scaled_dot_product_attention(queries, keys, values, params,
                                       h=h, d_k=d_k, d_v=d_v)
    out = jax.block_until_ready(out)

    ref = reference_attention(queries, keys, values, params, h=h, d_k=d_k, d_v=d_v)
    assert out.shape == (b_s, nq, d_model)
    # bf16 MXU operands / bf16-streamed activations (f32 accumulation):
    # check error relative to the reference's max magnitude.
    err = float(jnp.max(jnp.abs(out - ref)))
    scale = float(jnp.max(jnp.abs(ref)))
    assert err <= 5e-2 * scale + 5e-6, f"mismatch vs JAX reference: err={err}, scale={scale}"

    print("KERNEL_OK")
</pallas_src>

<mosaic_0001>
module attributes {stable_mosaic.version = 11 : i64} {
  func.func @_linear_kernel(%arg0: i32, %arg1: i32, %arg2: memref<1x128x128xbf16, #tpu.memory_space<vmem>>, %arg3: memref<128x128xbf16, #tpu.memory_space<vmem>>, %arg4: memref<1x128xf32, #tpu.memory_space<vmem>>, %arg5: memref<1x128x128xbf16, #tpu.memory_space<vmem>>) attributes {dimension_semantics = [#tpu.dimension_semantics<parallel>, #tpu.dimension_semantics<parallel>], iteration_bounds = array<i64: 2, 1>, scalar_prefetch = 0 : i64, scratch_operands = 0 : i64, tpu.core_type = #tpu.core_type<tc>, window_params = [{transform_indices = @transform_0, window_bounds = array<i64: 1, 128, 128>}, {pipeline_mode = #tpu.pipeline_mode<synchronous>, transform_indices = @transform_1, window_bounds = array<i64: 128, 128>}, {pipeline_mode = #tpu.pipeline_mode<synchronous>, transform_indices = @transform_2, window_bounds = array<i64: 1, 128>}, {transform_indices = @transform_3, window_bounds = array<i64: 1, 128, 128>}]} {
    %c0 = arith.constant 0 : index
    %c0_0 = arith.constant 0 : index
    %c0_1 = arith.constant 0 : index
    %0 = vector.load %arg2[%c0, %c0_0, %c0_1] : memref<1x128x128xbf16, #tpu.memory_space<vmem>>, vector<1x128x128xbf16>
    %1 = vector.shape_cast %0 : vector<1x128x128xbf16> to vector<128x128xbf16>
    %c0_2 = arith.constant 0 : index
    %c0_3 = arith.constant 0 : index
    %2 = vector.load %arg3[%c0_2, %c0_3] : memref<128x128xbf16, #tpu.memory_space<vmem>>, vector<128x128xbf16>
    %cst = arith.constant dense<0.000000e+00> : vector<128x128xf32>
    %3 = tpu.matmul %1, %2, %cst {dimension_numbers = #tpu.dot_dimension_numbers<[1], [0], [0], [1], [0, 0, 1, 1], [], []>} : vector<128x128xbf16>, vector<128x128xbf16>, vector<128x128xf32> -> vector<128x128xf32>
    %c0_4 = arith.constant 0 : index
    %c0_5 = arith.constant 0 : index
    %4 = vector.load %arg4[%c0_4, %c0_5] : memref<1x128xf32, #tpu.memory_space<vmem>>, vector<1x128xf32>
    %5 = vector.broadcast %4 : vector<1x128xf32> to vector<128x128xf32>
    %6 = arith.addf %3, %5 : vector<128x128xf32>
    %7 = arith.truncf %6 : vector<128x128xf32> to vector<128x128xbf16>
    %c0_6 = arith.constant 0 : index
    %c0_7 = arith.constant 0 : index
    %c0_8 = arith.constant 0 : index
    %8 = vector.load %arg5[%c0_6, %c0_7, %c0_8] : memref<1x128x128xbf16, #tpu.memory_space<vmem>>, vector<1x128x128xbf16>
    %9 = vector.shape_cast %8 : vector<1x128x128xbf16> to vector<128x128xbf16>
    %10 = vector.shape_cast %7 : vector<128x128xbf16> to vector<1x128x128xbf16>
    tpu.vector_store %arg5[%c0_6, %c0_7, %c0_8], %10 {strides = array<i32>} : memref<1x128x128xbf16, #tpu.memory_space<vmem>>, vector<1x128x128xbf16>,
    return
  }
  func.func @transform_0(%arg0: i32, %arg1: i32) -> (i32, i32, i32) {
    %c0_i32 = arith.constant 0 : i32
    %c0_i32_0 = arith.constant 0 : i32
    return %arg0, %arg1, %c0_i32 : i32, i32, i32
  }
  func.func @transform_1(%arg0: i32, %arg1: i32) -> (i32, i32) {
    %c0_i32 = arith.constant 0 : i32
    %c0_i32_0 = arith.constant 0 : i32
    %c0_i32_1 = arith.constant 0 : i32
    return %c0_i32, %c0_i32_0 : i32, i32
  }
  func.func @transform_2(%arg0: i32, %arg1: i32) -> (i32, i32) {
    %c0_i32 = arith.constant 0 : i32
    %c0_i32_0 = arith.constant 0 : i32
    %c0_i32_1 = arith.constant 0 : i32
    return %c0_i32, %c0_i32_0 : i32, i32
  }
  func.func @transform_3(%arg0: i32, %arg1: i32) -> (i32, i32, i32) {
    %c0_i32 = arith.constant 0 : i32
    %c0_i32_0 = arith.constant 0 : i32
    return %arg0, %arg1, %c0_i32 : i32, i32, i32
  }
}

</mosaic_0001>

<bundles_post_ra>
// kernel: tpu_custom_call.1
= control target key start
LH: loop header
LB: loop body
LE: loop exit
PB: predicated region body
PF: predicated region fallthrough
CT: control target
= control target key end

     0   :  { %s1160_s0 = inlined_call_operand.hbm [shape: bf16[2,128,128], index: 0, kind: input, shape index: {}]   ;;  %s1161_s1 = inlined_call_operand.hbm [shape: bf16[128,128], index: 1, kind: input, shape index: {}]   ;;  %s1162_s2 = inlined_call_operand.vmem [shape: f32[1,128], index: 2, kind: input, shape index: {}]   ;;  %s1163_s3 = inlined_call_operand.hbm [shape: bf16[2,128,128], index: 3, kind: output, shape index: {}]  }
   0x1   :  { %1165 = sst [smem:[#allocation11_spill]] %s1161_s1 }
   0x2   :  { %8 = vsyncpa [#allocation3], 0 }
   0x3   :  { %10 = vsyncpa [#allocation3 + $0x1], 0 }
   0x4   :  { %11 = vsyncpa [#allocation6], 0 }
   0x5   :  { %12 = vsyncpa [#allocation4], 0 }
   0x6   :  { %14 = vsyncpa [#allocation4 + $0x1], 0  ;;  %s977_s12 = smov 0   ;;  %s979_s13 = smov 0  }
   0x7   :  { %s981_s14 = smov 0   ;;  %s983_s15 = smov 0  }
   0x8   :  { %s985_s16 = smov 0   ;;  %s987_s17 = smov 0  }
   0x9 LB: > { %s556_s18 = sadd.s32 4294967295, %s950_s17   ;;  %s557_s19 = sadd.s32 4294967294, %s950_s17   ;;  %s950_s17 = sphi %s987_s17, %s20_s17   ;;  %s946_s16 = sphi %s985_s16, %s1179_s16   ;;  %s942_s15 = sphi %s983_s15, %s1178_s15   ;;  %s938_s14 = sphi %s981_s14, %s1177_s14   ;;  %s934_s13 = sphi %s979_s13, %s1176_s13   ;;  %s930_s12 = sphi %s977_s12, %s1175_s12  }
   0xa   : > { %p54_p0 = scmp.ne.s32.totalorder %s934_s13, %s930_s12  ;;  %p1011_p1 = scmp.eq.s32.totalorder %s556_s18, 0 }
   0xb   : > { %p1015_p2 = scmp.eq.s32.totalorder %s556_s18, 1  ;;  %p128_p3 = scmp.eq.s32.totalorder %s557_s19, 1 }
   0xc   : > { %p1021_p4 = por %p1011_p1, %p54_p0  ;;  %p558_p5 = scmp.ge.s32.totalorder %s950_s17, 1 }
   0xd   : > { %p1026_p6 = por %p128_p3, %p54_p0  ;;  %p135_p7 = scmp.lt.s32.totalorder %s950_s17, 3 }
   0xe   : > { %s1170_s1 = sld [smem:[#allocation11_spill]]  ;;  %s952_s28 = smov [#allocation5]  }
   0xf   : > { %p1034_p8 = pnand %p558_p5, %p135_p7  ;;  %s148_s29 = sshll.u32 %s952_s28, 4  ;;  %s149_s29 = int_to_ptr.vmem [resolvable:$true] %s148_s29 }
  0x10   : > { %p560_p11 = scmp.ge.s32.totalorder %s950_s17, 2  ;;  %s1164_s30 = smov 64  }
  0x11   : > { %p734_p9 = pneg %p1034_p8  ;;  %s954_s4 = smov 4  }
  0x12   : > { %s32_s5 = sadd.s32 1, %s946_s16  ;;  %s41_s6 = sadd.s32 1, %s938_s14 }
  0x13   : > { %p735_p10 = pnand %p734_p9, %p1011_p1  ;;  %p34_p12 = scmp.ge.s32.totalorder %s32_s5, 2 }
  0x14   : > { %s146_s26 = sshll.u32 %s1170_s1, 4  ;;  %p48_p13 = scmp.ne.s32.totalorder %s938_s14, %s934_s13  ;;  %s147_s26 = int_to_ptr.hbm [resolvable:$true] %s146_s26 }
  0x15   : > { %737 = dma.hbm_to_vmem [thread:$0]  (!%p735_p10), %s147_s26, 1024, %s149_s29, [#allocation6], %s1164_s30, %s1164_s30, %s954_s4  }
  0x16   : > { %p49_p0 = scmp.eq.s32.totalorder %s950_s17, 0  ;;  %s1181_s5 = smov (%p34_p12, %s32_s5), 0 }
  0x17   : > { %p1059_p5 = por %p1015_p2, %p48_p13  ;;  %s36_s9 = ssub.s32 %s946_s16, %s1181_s5 }
  0x18   : > { %p1053_p3 = por %p49_p0, %p48_p13  ;;  %p747_p7 = scmp.lt.s32.totalorder %s950_s17, 2 }
  0x19   : > { %p39_p9 = scmp.eq.s32.totalorder %s36_s9, 0  ;;  %s165_s10 = sand.u32 1, %s938_s14  }
  0x1a   : > { %s561_s11 = sshll.u32 %s165_s10, 6  ;;  %s637_s19 = sshll.u32 %s946_s16, 6 }
  0x1b   : > { %s1068_s18 = scalar_select %p39_p9, %s938_s14, %s41_s6  }
  0x1c   : > { %s176_s26 = scalar_lea.hbm %s1160_s0, %s637_s19  ;;  %s169_s28 = scalar_lea.vmem [#allocation2], %s561_s11 }
  0x1d   : > { %s179_s29 = sshll.u32 %s169_s28, 4  ;;  %s177_s21 = sshll.u32 %s176_s26, 4  ;;  %s180_s29 = int_to_ptr.vmem [resolvable:$true] %s179_s29  ;;  %s178_s21 = int_to_ptr.hbm [resolvable:$true] %s177_s21 }
  0x1e   : > { %p739_p2 = pnand %p747_p7, %p1053_p3  ;;  %s166_s30 = scalar_lea.sflag [#allocation3], %s165_s10 }
  0x1f   : > { %s1174_s1 = smov 64   ;;  %191 = sbr.rel (%p1034_p8) target bundleno = 237 (0xed), region = 32 }
  0x20   : > { %741 = dma.hbm_to_vmem [thread:$0]  (!%p739_p2), %s178_s21, 1024, %s180_s29, %s166_s30, %s1174_s1, %s1174_s1, %s954_s4  }
  0x21   : > { %s1082_s6 = sand.u32 (!%p1034_p8), 1, %s934_s13  }
  0x22   : > { %s565_s9 = sshll.u32 (!%p1034_p8), %s1082_s6, 6  ;;  %s194_s11 = scalar_lea.sflag (!%p1034_p8), [#allocation3], %s1082_s6 }
  0x23   : > { %s1088_s7 = scalar_lea.vmem (!%p1034_p8), [#allocation2], %s565_s9 }
  0x24   : > { %917 = dma.done.wait (%p1021_p4), %s194_s11, 1024  }
  0x25   : > { %919 = vsyncadd (%p1021_p4), %s194_s11, 4294966272 }
  0x26   : > { %921 = dma.done.wait (%p1011_p1), [#allocation6], 1024  }
  0x27   : > { %923 = vsyncadd (%p1011_p1), [#allocation6], 4294966272  ;;  %v653_v0 = vld [vmem:[#allocation5 + $0x38] sm:$0xff]  ;;  %v652_v1 = vld [vmem:[#allocation5 + $0x30] sm:$0xff]  ;;  %s1111_s22 = scalar_lea.vmem [#allocation7], %s565_s9  ;;  %s654_s27 = sshll.u32 %s942_s15, 6 }
  0x28   : > { %360 = vmatpush.bf16.msra.mxu0 %v653_v0  ;;  %702 = vmatpush.bf16.msra.mxu1 %v653_v0  ;;  %v651_v2 = vld [vmem:[#allocation5 + $0x28] sm:$0xff]  ;;  %v650_v3 = vld [vmem:[#allocation5 + $0x20] sm:$0xff]  ;;  %v649_v4 = vld [vmem:[#allocation5 + $0x18] sm:$0xff]  ;;  %s455_s10 = scalar_lea.hbm %s1163_s3, %s654_s27  ;;  %s456_s19 = sshll.u32 %s1111_s22, 4  ;;  %s457_s19 = int_to_ptr.vmem [resolvable:$true] %s456_s19 }
  0x29   : > { %703 = vmatpush.bf16.msra.mxu2 %v653_v0  ;;  %704 = vmatpush.bf16.msra.mxu3 %v653_v0  ;;  %v648_v5 = vld [vmem:[#allocation5 + $0x10] sm:$0xff]  ;;  %v647_v6 = vld [vmem:[#allocation5 + $0x8] sm:$0xff]  ;;  %v646_v7 = vld [vmem:[#allocation5] sm:$0xff]  ;;  %s458_s24 = sshll.u32 %s455_s10, 4  ;;  %s442_s15 = scalar_lea.sflag [#allocation4], %s1082_s6  ;;  %s459_s24 = int_to_ptr.hbm [resolvable:$true] %s458_s24 }
  0x2a   : > { %v638_v8 = vld [vmem:[%s1088_s7] sm:$0xff]  ;;  %v640_v9 = vld [vmem:[%s1088_s7 + $0x10] sm:$0xff]  ;;  %v639_v12 = vld [vmem:[%s1088_s7 + $0x8] sm:$0xff]  ;;  %s878_s25 = sshra.s32 %s459_s24, 4  ;;  %s884_s21 = scalar_lea.hbm %s1163_s3, 128  ;;  %s879_s25 = int_to_ptr.hbm [resolvable:$true] %s878_s25 }
  0x2b   : > { %v642_v10 = vld [vmem:[%s1088_s7 + $0x20] sm:$0xff]  ;;  %v644_v11 = vld [vmem:[%s1088_s7 + $0x30] sm:$0xff]  ;;  %v641_v13 = vld [vmem:[%s1088_s7 + $0x18] sm:$0xff]  ;;  %s880_s26 = scalar_lea.hbm %s879_s25, 64  ;;  %p885_p10 = scmp.lt.s32.totalorder %s879_s25, %s1163_s3 }
  0x2c   : > { %361 = vmatpush.bf16.msra.mxu0 %v652_v1  ;;  %705 = vmatpush.bf16.msra.mxu1 %v652_v1  ;;  %v643_v14 = vld [vmem:[%s1088_s7 + $0x28] sm:$0xff]  ;;  %v645_v15 = vld [vmem:[%s1088_s7 + $0x38] sm:$0xff]  ;;  %v803_v18 = vld [vmem:[%s1162_s2] ss:$0 sm:$0xff]  ;;  %p881_p1 = scmp.ne.s32.totalorder %s879_s25, %s880_s26  ;;  %p886_p12 = scmp.lt.s32.totalorder %s884_s21, %s880_s26 }
  0x2d   : > { %706 = vmatpush.bf16.msra.mxu2 %v652_v1  ;;  %707 = vmatpush.bf16.msra.mxu3 %v652_v1 }
  0x2e   : > { %p882_p4 = pnand %p881_p1, %p1059_p5  ;;  %p887_p13 = por %p886_p12, %p885_p10 }
  0x30   : > { %362 = vmatpush.bf16.msra.mxu0 %v651_v2  ;;  %708 = vmatpush.bf16.msra.mxu1 %v651_v2  ;;  %p883_p8 = pneg %p882_p4 }
  0x31   : > { %709 = vmatpush.bf16.msra.mxu2 %v651_v2  ;;  %710 = vmatpush.bf16.msra.mxu3 %v651_v2 }
  0x32   : > { %p888_p0 = pnand %p887_p13, %p883_p8 }
  0x34   : > { %363 = vmatpush.bf16.msra.mxu0 %v650_v3  ;;  %711 = vmatpush.bf16.msra.mxu1 %v650_v3 }
  0x35   : > { %712 = vmatpush.bf16.msra.mxu2 %v650_v3  ;;  %713 = vmatpush.bf16.msra.mxu3 %v650_v3 }
  0x38   : > { %364 = vmatpush.bf16.msra.mxu0 %v649_v4  ;;  %714 = vmatpush.bf16.msra.mxu1 %v649_v4 }
  0x39   : > { %715 = vmatpush.bf16.msra.mxu2 %v649_v4  ;;  %716 = vmatpush.bf16.msra.mxu3 %v649_v4 }
  0x3c   : > { %365 = vmatpush.bf16.msra.mxu0 %v648_v5  ;;  %717 = vmatpush.bf16.msra.mxu1 %v648_v5 }
  0x3d   : > { %718 = vmatpush.bf16.msra.mxu2 %v648_v5  ;;  %719 = vmatpush.bf16.msra.mxu3 %v648_v5 }
  0x40   : > { %366 = vmatpush.bf16.msra.mxu0 %v647_v6  ;;  %720 = vmatpush.bf16.msra.mxu1 %v647_v6 }
  0x41   : > { %721 = vmatpush.bf16.msra.mxu2 %v647_v6  ;;  %722 = vmatpush.bf16.msra.mxu3 %v647_v6 }
  0x44   : > { %367 = vmatpush.bf16.msra.mxu0 %v646_v7  ;;  %723 = vmatpush.bf16.msra.mxu1 %v646_v7 }
  0x45   : > { %724 = vmatpush.bf16.msra.mxu2 %v646_v7  ;;  %725 = vmatpush.bf16.msra.mxu3 %v646_v7 }
  0x47   : > { %368 = vmatmul.bf16.vlgmr.msra.gmra.mxu0 %v638_v8  ;;  %378 = vmatmul.bf16.vlgmr.msra.gmra.mxu1 %v640_v9 }
  0x48   : > { %388 = vmatmul.bf16.vlgmr.msra.gmra.mxu2 %v642_v10  ;;  %398 = vmatmul.bf16.vlgmr.msra.gmra.mxu3 %v644_v11 }
  0x57   : > { %373 = vmatmul.bf16.gmra.mxu0 %v639_v12  ;;  %383 = vmatmul.bf16.gmra.mxu1 %v641_v13 }
  0x58   : > { %393 = vmatmul.bf16.gmra.mxu2 %v643_v14  ;;  %403 = vmatmul.bf16.gmra.mxu3 %v645_v15 }
  0xc4   : > { %v369_v16 = vpop.f32.mrf.mxu0  ;;  %v379_v17 = vpop.f32.mrf.mxu1 }
  0xc5   : > { %v370_v23 = vadd.f32 %v803_v18, %v369_v16  ;;  %v380_v24 = vadd.f32 %v803_v18, %v379_v17 }
  0xcb   : > { %v389_v19 = vpop.f32.mrf.mxu2  ;;  %v399_v20 = vpop.f32.mrf.mxu3 }
  0xcc   : > { %v371_v21 = vpop.f32.mrf.mxu0  ;;  %v381_v22 = vpop.f32.mrf.mxu1  ;;  %v390_v31 = vadd.f32 %v803_v18, %v389_v19  ;;  %v400_v32 = vadd.f32 %v803_v18, %v399_v20 }
  0xcd   : > { %v372_v25 = vadd.f32 %v803_v18, %v371_v21  ;;  %v382_v26 = vadd.f32 %v803_v18, %v381_v22 }
  0xcf   : > { %v658_v27 = vpack.c.bf16 %v372_v25, %v370_v23  ;;  %v668_v28 = vpack.c.bf16 %v382_v26, %v380_v24 }
  0xd1   : > { %659 = vst [vmem:[%s1111_s22] sm:$0xff] %v658_v27  }
  0xd2   : > { %696 = vst [vmem:[%s1111_s22 + $0x10] sm:$0xff] %v668_v28  }
  0xd3   : > { %v391_v29 = vpop.f32.mrf.mxu2  ;;  %v401_v30 = vpop.f32.mrf.mxu3 }
  0xd4   : > { %v392_v33 = vadd.f32 %v803_v18, %v391_v29  ;;  %v402_v34 = vadd.f32 %v803_v18, %v401_v30  ;;  %v374_v35 = vpop.f32.mrf.mxu0  ;;  %v384_v36 = vpop.f32.mrf.mxu1 }
  0xd5   : > { %v375_v43 = vadd.f32 %v803_v18, %v374_v35  ;;  %v385_v44 = vadd.f32 %v803_v18, %v384_v36 }
  0xd6   : > { %v678_v37 = vpack.c.bf16 %v392_v33, %v390_v31  ;;  %v688_v38 = vpack.c.bf16 %v402_v34, %v400_v32 }
  0xd8   : > { %698 = vst [vmem:[%s1111_s22 + $0x20] sm:$0xff] %v678_v37  }
  0xd9   : > { %700 = vst [vmem:[%s1111_s22 + $0x30] sm:$0xff] %v688_v38  }
  0xdb   : > { %v394_v39 = vpop.f32.mrf.mxu2  ;;  %v404_v40 = vpop.f32.mrf.mxu3 }
  0xdc   : > { %v376_v41 = vpop.f32.mrf.mxu0  ;;  %v386_v42 = vpop.f32.mrf.mxu1  ;;  %v395_v51 = vadd.f32 %v803_v18, %v394_v39  ;;  %v405_v52 = vadd.f32 %v803_v18, %v404_v40 }
  0xdd   : > { %v377_v45 = vadd.f32 %v803_v18, %v376_v41  ;;  %v387_v46 = vadd.f32 %v803_v18, %v386_v42 }
  0xdf   : > { %v663_v47 = vpack.c.bf16 %v377_v45, %v375_v43  ;;  %v673_v48 = vpack.c.bf16 %v387_v46, %v385_v44 }
  0xe1   : > { %695 = vst [vmem:[%s1111_s22 + $0x8] sm:$0xff] %v663_v47  }
  0xe2   : > { %697 = vst [vmem:[%s1111_s22 + $0x18] sm:$0xff] %v673_v48  }
  0xe3   : > { %v396_v49 = vpop.f32.mrf.mxu2  ;;  %v406_v50 = vpop.f32.mrf.mxu3 }
  0xe4   : > { %v397_v53 = vadd.f32 %v803_v18, %v396_v49  ;;  %v407_v54 = vadd.f32 %v803_v18, %v406_v50 }
  0xe6   : > { %v683_v55 = vpack.c.bf16 %v397_v53, %v395_v51  ;;  %v693_v56 = vpack.c.bf16 %v407_v54, %v405_v52 }
  0xe8   : > { %699 = vst [vmem:[%s1111_s22 + $0x28] sm:$0xff] %v683_v55  }
  0xe9   : > { %701 = vst [vmem:[%s1111_s22 + $0x38] sm:$0xff] %v693_v56  }
  0xea   : > { %891 = shalt.err (!%p888_p0)
}
  0xeb   : > { %s955_s6 = smov 64   ;;  %s956_s7 = smov 4  }
  0xec   : > { %732 = dma.vmem_to_hbm [thread:$0]  (%p1059_p5), %s457_s19, 1024, %s459_s24, %s442_s15, %s955_s6, %s955_s6, %s956_s7  }
  0xed PF: > { %s473_s1 = sand.u32 1, %s930_s12   ;;  %p743_p3 = pnand %p560_p11, %p1026_p6 }
  0xee   : > { %s474_s20 = scalar_lea.sflag [#allocation4], %s473_s1 }
  0xef   : > { %p744_p7 = pneg %p743_p3 }
  0xf1   : > { %925 = dma.done.wait (%p744_p7), %s474_s20, 1024  }
  0xf2   : > { %927 = vsyncadd (%p744_p7), %s474_s20, 4294966272  ;;  %s20_s17 = sadd.s32 1, %s950_s17   ;;  %s1175_s12 = smov %s934_s13 }
  0xf3   : > { %p17_p9 = scmp.ge.s32.totalorder %s20_s17, 4   ;;  %s1176_s13 = smov %s938_s14 }
  0xf4   : > { %s1177_s14 = smov %s1068_s18  ;;  %s1178_s15 = smov %s946_s16 }
  0xf5   : > { %s1179_s16 = smov %s1181_s5  ;;  %19 = sbr.rel (!%p17_p9) target bundleno = 9 (0x9), region = 81 }
  0xfa   :  { %480 = vsyncpa [#allocation3], 1 }
  0xfb   :  { %482 = vsyncpa [#allocation3 + $0x1], 1 }
  0xfc   :  { %483 = vsyncpa [#allocation6], 1 }
  0xfd   :  { %484 = vsyncpa [#allocation4], 1 }
  0xfe   :  { %486 = vsyncpa [#allocation4 + $0x1], 1 }

</bundles_post_ra>
